<compile_context>
chip_gen: v5e
topology: v5e:2x2
jax: 0.10.0
libtpu: 0.0.40
codegen_flags: <defaults>
</compile_context>

<pallas_src>
import jax
import jax.numpy as jnp
from jax.experimental import pallas as pl
from jax.experimental.pallas import tpu as pltpu

_LANE_BLOCK = 512  # 512-1024 lanes is the measured HBM-roofline sweet spot


# ----------------------------------------------------------------------------
# Fused Pallas kernel: per-scale partial sums for all losses, all scales
# ----------------------------------------------------------------------------
def _make_fused_kernel(num_scales: int, has_count: bool):
    def kernel(block_scale_ref,                 # SMEM (G,) int32: scale id per lane-block
               pp_ref, tp_ref,                  # (B, LB)    pred / target prob
               plm_ref, tlm_ref,                # (B, C, LB) pred / target loc (native NCHW order)
               bce_out, locsq_out, mcnt_out, pcnt_out):
        g = pl.program_id(0)

        @pl.when(g == 0)
        def _init():
            bce_out[...] = jnp.zeros_like(bce_out)
            locsq_out[...] = jnp.zeros_like(locsq_out)
            mcnt_out[...] = jnp.zeros_like(mcnt_out)
            pcnt_out[...] = jnp.zeros_like(pcnt_out)

        # one-hot over the per-scale output lane for this block's scale
        sid = block_scale_ref[g]
        lane = jax.lax.broadcasted_iota(jnp.int32, (1, num_scales), 1)
        onehot = (lane == sid).astype(jnp.float32)            # (1, S)

        p = pp_ref[...].astype(jnp.float32)                   # (B, LB)
        t = tp_ref[...].astype(jnp.float32)                   # (B, LB)

        # --- BCE sum (torch.BCELoss clamps log at -100); padded lanes give 0.
        log_p = jnp.maximum(jnp.log(p), -100.0)
        log_1mp = jnp.maximum(jnp.log(1.0 - p), -100.0)
        bce = -(t * log_p + (1.0 - t) * log_1mp)
        bce_out[...] += jnp.sum(bce, keepdims=True) * onehot

        # --- per-batch predicted count (sum of prob map); statically skipped
        #     when the target dict carries no emitter_count.
        if has_count:
            pcnt_out[...] += jnp.sum(p, axis=-1, keepdims=True) * onehot   # (B,1)*(1,S)

        # --- masked localisation squared error: square all channels
        #     elementwise, one channel reduce, one masked full reduce.
        mask = t > 0.5                                        # (B, LB)
        dl = plm_ref[...].astype(jnp.float32) - tlm_ref[...].astype(jnp.float32)
        sq = jnp.sum(dl * dl, axis=1)                         # (B, LB)
        locsq_out[...] += jnp.sum(jnp.where(mask, sq, 0.0), keepdims=True) * onehot
        mcnt_out[...] += jnp.sum(mask.astype(jnp.float32), keepdims=True) * onehot

    return kernel


def _fused_scale_sums(block_scale, pp_cat, tp_cat, plm_cat, tlm_cat,
                      *, lane_block, num_scales, has_count):
    """Returns per-scale raw sums: bce_sum(1,S), locsq(1,S), mask_cnt(1,S), pred_count(B,S)."""
    B, lpad = pp_cat.shape
    C = plm_cat.shape[1]
    num_blocks = lpad // lane_block

    grid_spec = pltpu.PrefetchScalarGridSpec(
        num_scalar_prefetch=1,
        grid=(num_blocks,),
        in_specs=[
            pl.BlockSpec((B, lane_block), lambda g, bs: (0, g)),
            pl.BlockSpec((B, lane_block), lambda g, bs: (0, g)),
            pl.BlockSpec((B, C, lane_block), lambda g, bs: (0, 0, g)),
            pl.BlockSpec((B, C, lane_block), lambda g, bs: (0, 0, g)),
        ],
        out_specs=[
            pl.BlockSpec((1, num_scales), lambda g, bs: (0, 0)),
            pl.BlockSpec((1, num_scales), lambda g, bs: (0, 0)),
            pl.BlockSpec((1, num_scales), lambda g, bs: (0, 0)),
            pl.BlockSpec((B, num_scales), lambda g, bs: (0, 0)),
        ],
    )
    out_shape = (
        jax.ShapeDtypeStruct((1, num_scales), jnp.float32),
        jax.ShapeDtypeStruct((1, num_scales), jnp.float32),
        jax.ShapeDtypeStruct((1, num_scales), jnp.float32),
        jax.ShapeDtypeStruct((B, num_scales), jnp.float32),
    )
    return pl.pallas_call(
        _make_fused_kernel(num_scales, has_count),
        grid_spec=grid_spec,
        out_shape=out_shape,
        compiler_params=pltpu.CompilerParams(
            dimension_semantics=("arbitrary",)),   # accumulating grid axis
    )(block_scale, pp_cat, tp_cat, plm_cat, tlm_cat)


def _pad_lanes(x, target_len):
    pad = target_len - x.shape[-1]
    if pad == 0:
        return x
    return jnp.pad(x, [(0, 0)] * (x.ndim - 1) + [(0, pad)])


# ----------------------------------------------------------------------------
# VAREmitterLoss wrapper (matches the PyTorch forward semantics)
# ----------------------------------------------------------------------------
def var_emitter_loss(predictions, targets, prob_weight=1.0, loc_weight=1.0,
                     vq_weight=0.1, count_weight=1.0, scale_weights=None,
                     lane_block=_LANE_BLOCK):
    scale_weights = scale_weights or [0.5, 0.7, 0.9, 1.0]
    emitter_count = targets.get('emitter_count', None)
    has_count = emitter_count is not None

    losses = {}
    total = jnp.float32(0.0)

    scale_keys = [k for k in predictions.keys()
                  if k.startswith('scale_') and k in targets]
    if not scale_keys:
        losses['total'] = total
        return losses

    B = predictions[scale_keys[0]]['prob_map'].shape[0]
    C = predictions[scale_keys[0]]['loc_map'].shape[1]

    if has_count:
        cnt_vec = jnp.asarray(emitter_count, jnp.float32).reshape(-1)
        if cnt_vec.shape[0] == 1 and B > 1:
            cnt_vec = jnp.broadcast_to(cnt_vec, (B,))

    # --- build lane-concatenated (block-aligned) buffers for all scales ---
    pp_parts, tp_parts, ploc_parts, tloc_parts, bs_parts, hw_list = [], [], [], [], [], []
    for s, key in enumerate(scale_keys):
        pm = predictions[key]['prob_map']
        tm = targets[key]['prob_map']
        lm = predictions[key]['loc_map']
        tlm = targets[key]['loc_map']
        b, _, h, w = pm.shape
        hw = h * w
        nblk = pl.cdiv(hw, lane_block)
        lpad = nblk * lane_block
        pp_parts.append(_pad_lanes(pm.reshape(b, hw), lpad))
        tp_parts.append(_pad_lanes(tm.reshape(b, hw), lpad))
        ploc_parts.append(_pad_lanes(lm.reshape(b, C, hw), lpad))      # free reshape (NCHW)
        tloc_parts.append(_pad_lanes(tlm.reshape(b, C, hw), lpad))
        bs_parts.append(jnp.full((nblk,), s, jnp.int32))
        hw_list.append(hw)

    pp_cat = jnp.concatenate(pp_parts, axis=-1)
    tp_cat = jnp.concatenate(tp_parts, axis=-1)
    plm_cat = jnp.concatenate(ploc_parts, axis=-1)
    tlm_cat = jnp.concatenate(tloc_parts, axis=-1)
    block_scale = jnp.concatenate(bs_parts, axis=0)

    bce_sums, locsq_sums, mcnt_sums, pcnt_sums = _fused_scale_sums(
        block_scale, pp_cat, tp_cat, plm_cat, tlm_cat,
        lane_block=lane_block, num_scales=len(scale_keys), has_count=has_count)

    # --- per-scale finalize (cheap scalar work) ---
    for s, key in enumerate(scale_keys):
        scale_idx = int(key.split('_')[1])
        sw = scale_weights[min(scale_idx, len(scale_weights) - 1)]

        prob_l = bce_sums[0, s] / float(B * hw_list[s])

        mcnt = mcnt_sums[0, s]
        loc_l = jnp.where(mcnt > 0.0,
                          locsq_sums[0, s] / jnp.maximum(mcnt * float(C), 1.0),
                          0.0)

        if has_count:
            # TODO(synk): CountLoss is not defined in the provided source; assumed
            # predicted_count = prob_map.sum(per sample), loss = MSE vs target count.
            cnt_l = jnp.mean((pcnt_sums[:, s] - cnt_vec) ** 2)
        else:
            cnt_l = jnp.float32(0.0)

        vq_l = jnp.asarray(predictions[key]['vq_loss'], jnp.float32)
        scale_loss = sw * (prob_weight * prob_l + loc_weight * loc_l
                           + vq_weight * vq_l + count_weight * cnt_l)
        total = total + scale_loss
        losses[f'{key}_prob'] = prob_l
        losses[f'{key}_loc'] = loc_l
        losses[f'{key}_vq'] = vq_l
        losses[f'{key}_count'] = cnt_l
        losses[f'{key}_total'] = scale_loss

    losses['total'] = total
    return losses


# ----------------------------------------------------------------------------
# Pure-JAX reference for verification
# ----------------------------------------------------------------------------
def _ref_scale_losses(pred_prob, tgt_prob, pred_loc, tgt_loc, cnt):
    p = pred_prob.astype(jnp.float32)
    t = tgt_prob.astype(jnp.float32)
    bce = -(t * jnp.maximum(jnp.log(p), -100.0)
            + (1.0 - t) * jnp.maximum(jnp.log(1.0 - p), -100.0))
    prob_l = jnp.mean(bce)
    pred_count = jnp.sum(p.reshape(p.shape[0], -1), axis=-1)
    cnt_l = jnp.mean((pred_count - cnt) ** 2)
    mask = (t > 0.5)
    mask_c = jnp.broadcast_to(mask, pred_loc.shape)
    sq = (pred_loc.astype(jnp.float32) - tgt_loc.astype(jnp.float32)) ** 2
    msum = jnp.sum(jnp.where(mask_c, sq, 0.0))
    mcnt = jnp.sum(mask_c.astype(jnp.float32))
    loc_l = jnp.where(mcnt > 0, msum / jnp.maximum(mcnt, 1.0), 0.0)
    return prob_l, loc_l, cnt_l


if __name__ == "__main__":
    key = jax.random.PRNGKey(0)
    B, C = 2, 3                       # batch, loc-map channels (x,y,z offsets)
    scale_sizes = [4, 8, 16, 32]      # spatial resolution per VAR scale
    scale_weights = [0.5, 0.7, 0.9, 1.0]

    predictions, targets = {}, {}
    for i, s in enumerate(scale_sizes):
        key, k1, k2, k3, k4, k5 = jax.random.split(key, 6)
        pred_prob = jax.nn.sigmoid(jax.random.normal(k1, (B, 1, s, s), jnp.float32))
        pred_loc = jax.random.normal(k2, (B, C, s, s), jnp.float32)
        tgt_prob = (jax.random.uniform(k3, (B, 1, s, s)) > 0.8).astype(jnp.float32)
        tgt_loc = jax.random.normal(k4, (B, C, s, s), jnp.float32)
        vq_loss = jnp.abs(jax.random.normal(k5, (), jnp.float32)) * 0.1
        predictions[f'scale_{i}'] = {'prob_map': pred_prob, 'loc_map': pred_loc,
                                     'vq_loss': vq_loss}
        targets[f'scale_{i}'] = {'prob_map': tgt_prob, 'loc_map': tgt_loc}
    targets['emitter_count'] = jnp.array([5.0, 7.0], jnp.float32)

    losses = var_emitter_loss(predictions, targets, scale_weights=scale_weights)
    jax.block_until_ready(losses['total'])

    # Verify against a pure-JAX reference of the same forward pass.
    ref_total = jnp.float32(0.0)
    for i in range(len(scale_sizes)):
        pkey = f'scale_{i}'
        pred, tgt = predictions[pkey], targets[pkey]
        pr, lo, co = _ref_scale_losses(pred['prob_map'], tgt['prob_map'],
                                       pred['loc_map'], tgt['loc_map'],
                                       targets['emitter_count'])
        sw = scale_weights[min(i, len(scale_weights) - 1)]
        ref_total = ref_total + sw * (1.0 * pr + 1.0 * lo
                                      + 0.1 * pred['vq_loss'] + 1.0 * co)
        assert jnp.allclose(losses[f'{pkey}_prob'], pr, rtol=1e-4, atol=1e-5), pkey
        assert jnp.allclose(losses[f'{pkey}_loc'], lo, rtol=1e-4, atol=1e-5), pkey
        assert jnp.allclose(losses[f'{pkey}_count'], co, rtol=1e-4, atol=1e-4), pkey
    assert jnp.allclose(losses['total'], ref_total, rtol=1e-4, atol=1e-4)

    print("KERNEL_OK")
</pallas_src>

<mosaic_0001>
module attributes {stable_mosaic.version = 11 : i64} {
  func.func @kernel(%arg0: i32, %arg1: memref<5xi32, #tpu.memory_space<smem>>, %arg2: memref<2x512xf32, #tpu.memory_space<vmem>>, %arg3: memref<2x512xf32, #tpu.memory_space<vmem>>, %arg4: memref<2x3x512xf32, #tpu.memory_space<vmem>>, %arg5: memref<2x3x512xf32, #tpu.memory_space<vmem>>, %arg6: memref<1x4xf32, #tpu.memory_space<vmem>>, %arg7: memref<1x4xf32, #tpu.memory_space<vmem>>, %arg8: memref<1x4xf32, #tpu.memory_space<vmem>>, %arg9: memref<2x4xf32, #tpu.memory_space<vmem>>) attributes {dimension_semantics = [#tpu.dimension_semantics<arbitrary>], iteration_bounds = array<i64: 5>, scalar_prefetch = 1 : i64, scratch_operands = 0 : i64, tpu.core_type = #tpu.core_type<tc>, window_params = [{transform_indices = @transform_0, window_bounds = array<i64: 2, 512>}, {transform_indices = @transform_1, window_bounds = array<i64: 2, 512>}, {transform_indices = @transform_2, window_bounds = array<i64: 2, 3, 512>}, {transform_indices = @transform_3, window_bounds = array<i64: 2, 3, 512>}, {pipeline_mode = #tpu.pipeline_mode<synchronous>, transform_indices = @transform_4, window_bounds = array<i64: 1, 4>}, {pipeline_mode = #tpu.pipeline_mode<synchronous>, transform_indices = @transform_5, window_bounds = array<i64: 1, 4>}, {pipeline_mode = #tpu.pipeline_mode<synchronous>, transform_indices = @transform_6, window_bounds = array<i64: 1, 4>}, {pipeline_mode = #tpu.pipeline_mode<synchronous>, transform_indices = @transform_7, window_bounds = array<i64: 2, 4>}]} {
    %c0_i32 = arith.constant 0 : i32
    %0 = arith.cmpi eq, %arg0, %c0_i32 : i32
    %1 = arith.extui %0 : i1 to i32
    %c0_i32_0 = arith.constant 0 : i32
    %2 = arith.cmpi ne, %1, %c0_i32_0 : i32
    scf.if %2 {
      %cst_37 = arith.constant 0.000000e+00 : f32
      %76 = vector.broadcast %cst_37 : f32 to vector<1x4xf32>
      %c0_38 = arith.constant 0 : index
      %c0_39 = arith.constant 0 : index
      %77 = vector.load %arg6[%c0_38, %c0_39] : memref<1x4xf32, #tpu.memory_space<vmem>>, vector<1x4xf32>
      tpu.vector_store %arg6[%c0_38, %c0_39], %76 {strides = array<i32>} : memref<1x4xf32, #tpu.memory_space<vmem>>, vector<1x4xf32>,
      %cst_40 = arith.constant 0.000000e+00 : f32
      %78 = vector.broadcast %cst_40 : f32 to vector<1x4xf32>
      %c0_41 = arith.constant 0 : index
      %c0_42 = arith.constant 0 : index
      %79 = vector.load %arg7[%c0_41, %c0_42] : memref<1x4xf32, #tpu.memory_space<vmem>>, vector<1x4xf32>
      tpu.vector_store %arg7[%c0_41, %c0_42], %78 {strides = array<i32>} : memref<1x4xf32, #tpu.memory_space<vmem>>, vector<1x4xf32>,
      %cst_43 = arith.constant 0.000000e+00 : f32
      %80 = vector.broadcast %cst_43 : f32 to vector<1x4xf32>
      %c0_44 = arith.constant 0 : index
      %c0_45 = arith.constant 0 : index
      %81 = vector.load %arg8[%c0_44, %c0_45] : memref<1x4xf32, #tpu.memory_space<vmem>>, vector<1x4xf32>
      tpu.vector_store %arg8[%c0_44, %c0_45], %80 {strides = array<i32>} : memref<1x4xf32, #tpu.memory_space<vmem>>, vector<1x4xf32>,
      %cst_46 = arith.constant 0.000000e+00 : f32
      %82 = vector.broadcast %cst_46 : f32 to vector<2x4xf32>
      %c0_47 = arith.constant 0 : index
      %c0_48 = arith.constant 0 : index
      %83 = vector.load %arg9[%c0_47, %c0_48] : memref<2x4xf32, #tpu.memory_space<vmem>>, vector<2x4xf32>
      tpu.vector_store %arg9[%c0_47, %c0_48], %82 {strides = array<i32>} : memref<2x4xf32, #tpu.memory_space<vmem>>, vector<2x4xf32>,
    } else {
    }
    %3 = arith.index_cast %arg0 : i32 to index
    %4 = memref.load %arg1[%3] : memref<5xi32, #tpu.memory_space<smem>>
    %5 = tpu.iota {dimensions = array<i32: 1>} : vector<1x4xi32>
    %6 = vector.broadcast %4 : i32 to vector<1x4xi32>
    %7 = arith.cmpi eq, %5, %6 : vector<1x4xi32>
    %8 = arith.extui %7 : vector<1x4xi1> to vector<1x4xi32>
    %9 = arith.sitofp %8 : vector<1x4xi32> to vector<1x4xf32>
    %c0 = arith.constant 0 : index
    %c0_1 = arith.constant 0 : index
    %10 = vector.load %arg2[%c0, %c0_1] : memref<2x512xf32, #tpu.memory_space<vmem>>, vector<2x512xf32>
    %c0_2 = arith.constant 0 : index
    %c0_3 = arith.constant 0 : index
    %11 = vector.load %arg3[%c0_2, %c0_3] : memref<2x512xf32, #tpu.memory_space<vmem>>, vector<2x512xf32>
    %12 = math.log %10 : vector<2x512xf32>
    %cst = arith.constant -1.000000e+02 : f32
    %13 = vector.broadcast %cst : f32 to vector<2x512xf32>
    %14 = arith.maximumf %12, %13 : vector<2x512xf32>
    %cst_4 = arith.constant 1.000000e+00 : f32
    %15 = vector.broadcast %cst_4 : f32 to vector<2x512xf32>
    %16 = arith.subf %15, %10 : vector<2x512xf32>
    %17 = math.log %16 : vector<2x512xf32>
    %cst_5 = arith.constant -1.000000e+02 : f32
    %18 = vector.broadcast %cst_5 : f32 to vector<2x512xf32>
    %19 = arith.maximumf %17, %18 : vector<2x512xf32>
    %20 = arith.mulf %11, %14 : vector<2x512xf32>
    %cst_6 = arith.constant 1.000000e+00 : f32
    %21 = vector.broadcast %cst_6 : f32 to vector<2x512xf32>
    %22 = arith.subf %21, %11 : vector<2x512xf32>
    %23 = arith.mulf %22, %19 : vector<2x512xf32>
    %24 = arith.addf %20, %23 : vector<2x512xf32>
    %cst_7 = arith.constant 0.000000e+00 : f32
    %25 = vector.broadcast %cst_7 : f32 to vector<2x512xf32>
    %26 = arith.subf %25, %24 : vector<2x512xf32>
    %c0_8 = arith.constant 0 : index
    %c0_9 = arith.constant 0 : index
    %27 = vector.load %arg6[%c0_8, %c0_9] : memref<1x4xf32, #tpu.memory_space<vmem>>, vector<1x4xf32>
    %28 = vector.shape_cast %26 : vector<2x512xf32> to vector<1x2x512xf32>
    %cst_10 = arith.constant dense<0.000000e+00> : vector<1xf32>
    %29 = vector.multi_reduction <add>, %28, %cst_10 [1, 2] : vector<1x2x512xf32> to vector<1xf32>
    %30 = vector.shape_cast %29 : vector<1xf32> to vector<1x1x1xf32>
    %31 = vector.extract %30[0, 0, 0] : f32 from vector<1x1x1xf32>
    %32 = vector.broadcast %31 : f32 to vector<1x1xf32>
    %33 = vector.broadcast %32 : vector<1x1xf32> to vector<1x4xf32>
    %34 = arith.mulf %33, %9 : vector<1x4xf32>
    %35 = arith.addf %27, %34 : vector<1x4xf32>
    %c0_11 = arith.constant 0 : index
    %c0_12 = arith.constant 0 : index
    %36 = vector.load %arg6[%c0_11, %c0_12] : memref<1x4xf32, #tpu.memory_space<vmem>>, vector<1x4xf32>
    tpu.vector_store %arg6[%c0_11, %c0_12], %35 {strides = array<i32>} : memref<1x4xf32, #tpu.memory_space<vmem>>, vector<1x4xf32>,
    %c0_13 = arith.constant 0 : index
    %c0_14 = arith.constant 0 : index
    %37 = vector.load %arg9[%c0_13, %c0_14] : memref<2x4xf32, #tpu.memory_space<vmem>>, vector<2x4xf32>
    %cst_15 = arith.constant dense<0.000000e+00> : vector<2xf32>
    %38 = vector.multi_reduction <add>, %10, %cst_15 [1] : vector<2x512xf32> to vector<2xf32>
    %39 = vector.shape_cast %38 : vector<2xf32> to vector<2x1xf32>
    %40 = vector.broadcast %39 : vector<2x1xf32> to vector<2x4xf32>
    %41 = vector.broadcast %9 : vector<1x4xf32> to vector<2x4xf32>
    %42 = arith.mulf %40, %41 : vector<2x4xf32>
    %43 = arith.addf %37, %42 : vector<2x4xf32>
    %c0_16 = arith.constant 0 : index
    %c0_17 = arith.constant 0 : index
    %44 = vector.load %arg9[%c0_16, %c0_17] : memref<2x4xf32, #tpu.memory_space<vmem>>, vector<2x4xf32>
    tpu.vector_store %arg9[%c0_16, %c0_17], %43 {strides = array<i32>} : memref<2x4xf32, #tpu.memory_space<vmem>>, vector<2x4xf32>,
    %cst_18 = arith.constant 5.000000e-01 : f32
    %45 = vector.broadcast %cst_18 : f32 to vector<2x512xf32>
    %46 = arith.cmpf ogt, %11, %45 : vector<2x512xf32>
    %c0_19 = arith.constant 0 : index
    %c0_20 = arith.constant 0 : index
    %c0_21 = arith.constant 0 : index
    %47 = vector.load %arg4[%c0_19, %c0_20, %c0_21] : memref<2x3x512xf32, #tpu.memory_space<vmem>>, vector<2x3x512xf32>
    %c0_22 = arith.constant 0 : index
    %c0_23 = arith.constant 0 : index
    %c0_24 = arith.constant 0 : index
    %48 = vector.load %arg5[%c0_22, %c0_23, %c0_24] : memref<2x3x512xf32, #tpu.memory_space<vmem>>, vector<2x3x512xf32>
    %49 = arith.subf %47, %48 : vector<2x3x512xf32>
    %50 = arith.mulf %49, %49 : vector<2x3x512xf32>
    %cst_25 = arith.constant dense<0.000000e+00> : vector<2x512xf32>
    %51 = vector.multi_reduction <add>, %50, %cst_25 [1] : vector<2x3x512xf32> to vector<2x512xf32>
    %c0_26 = arith.constant 0 : index
    %c0_27 = arith.constant 0 : index
    %52 = vector.load %arg7[%c0_26, %c0_27] : memref<1x4xf32, #tpu.memory_space<vmem>>, vector<1x4xf32>
    %cst_28 = arith.constant 0.000000e+00 : f32
    %53 = vector.broadcast %cst_28 : f32 to vector<2x512xf32>
    %54 = arith.select %46, %51, %53 : vector<2x512xi1>, vector<2x512xf32>
    %55 = vector.shape_cast %54 : vector<2x512xf32> to vector<1x2x512xf32>
    %cst_29 = arith.constant dense<0.000000e+00> : vector<1xf32>
    %56 = vector.multi_reduction <add>, %55, %cst_29 [1, 2] : vector<1x2x512xf32> to vector<1xf32>
    %57 = vector.shape_cast %56 : vector<1xf32> to vector<1x1x1xf32>
    %58 = vector.extract %57[0, 0, 0] : f32 from vector<1x1x1xf32>
    %59 = vector.broadcast %58 : f32 to vector<1x1xf32>
    %60 = vector.broadcast %59 : vector<1x1xf32> to vector<1x4xf32>
    %61 = arith.mulf %60, %9 : vector<1x4xf32>
    %62 = arith.addf %52, %61 : vector<1x4xf32>
    %c0_30 = arith.constant 0 : index
    %c0_31 = arith.constant 0 : index
    %63 = vector.load %arg7[%c0_30, %c0_31] : memref<1x4xf32, #tpu.memory_space<vmem>>, vector<1x4xf32>
    tpu.vector_store %arg7[%c0_30, %c0_31], %62 {strides = array<i32>} : memref<1x4xf32, #tpu.memory_space<vmem>>, vector<1x4xf32>,
    %c0_32 = arith.constant 0 : index
    %c0_33 = arith.constant 0 : index
    %64 = vector.load %arg8[%c0_32, %c0_33] : memref<1x4xf32, #tpu.memory_space<vmem>>, vector<1x4xf32>
    %65 = arith.extui %46 : vector<2x512xi1> to vector<2x512xi32>
    %66 = arith.sitofp %65 : vector<2x512xi32> to vector<2x512xf32>
    %67 = vector.shape_cast %66 : vector<2x512xf32> to vector<1x2x512xf32>
    %cst_34 = arith.constant dense<0.000000e+00> : vector<1xf32>
    %68 = vector.multi_reduction <add>, %67, %cst_34 [1, 2] : vector<1x2x512xf32> to vector<1xf32>
    %69 = vector.shape_cast %68 : vector<1xf32> to vector<1x1x1xf32>
    %70 = vector.extract %69[0, 0, 0] : f32 from vector<1x1x1xf32>
    %71 = vector.broadcast %70 : f32 to vector<1x1xf32>
    %72 = vector.broadcast %71 : vector<1x1xf32> to vector<1x4xf32>
    %73 = arith.mulf %72, %9 : vector<1x4xf32>
    %74 = arith.addf %64, %73 : vector<1x4xf32>
    %c0_35 = arith.constant 0 : index
    %c0_36 = arith.constant 0 : index
    %75 = vector.load %arg8[%c0_35, %c0_36] : memref<1x4xf32, #tpu.memory_space<vmem>>, vector<1x4xf32>
    tpu.vector_store %arg8[%c0_35, %c0_36], %74 {strides = array<i32>} : memref<1x4xf32, #tpu.memory_space<vmem>>, vector<1x4xf32>,
    return
  }
  func.func @transform_0(%arg0: i32, %arg1: memref<5xi32, #tpu.memory_space<smem>>) -> (i32, i32) {
    %c0_i32 = arith.constant 0 : i32
    %c0_i32_0 = arith.constant 0 : i32
    return %c0_i32, %arg0 : i32, i32
  }
  func.func @transform_1(%arg0: i32, %arg1: memref<5xi32, #tpu.memory_space<smem>>) -> (i32, i32) {
    %c0_i32 = arith.constant 0 : i32
    %c0_i32_0 = arith.constant 0 : i32
    return %c0_i32, %arg0 : i32, i32
  }
  func.func @transform_2(%arg0: i32, %arg1: memref<5xi32, #tpu.memory_space<smem>>) -> (i32, i32, i32) {
    %c0_i32 = arith.constant 0 : i32
    %c0_i32_0 = arith.constant 0 : i32
    %c0_i32_1 = arith.constant 0 : i32
    return %c0_i32, %c0_i32_0, %arg0 : i32, i32, i32
  }
  func.func @transform_3(%arg0: i32, %arg1: memref<5xi32, #tpu.memory_space<smem>>) -> (i32, i32, i32) {
    %c0_i32 = arith.constant 0 : i32
    %c0_i32_0 = arith.constant 0 : i32
    %c0_i32_1 = arith.constant 0 : i32
    return %c0_i32, %c0_i32_0, %arg0 : i32, i32, i32
  }
  func.func @transform_4(%arg0: i32, %arg1: memref<5xi32, #tpu.memory_space<smem>>) -> (i32, i32) {
    %c0_i32 = arith.constant 0 : i32
    %c0_i32_0 = arith.constant 0 : i32
    %c0_i32_1 = arith.constant 0 : i32
    return %c0_i32, %c0_i32_0 : i32, i32
  }
  func.func @transform_5(%arg0: i32, %arg1: memref<5xi32, #tpu.memory_space<smem>>) -> (i32, i32) {
    %c0_i32 = arith.constant 0 : i32
    %c0_i32_0 = arith.constant 0 : i32
    %c0_i32_1 = arith.constant 0 : i32
    return %c0_i32, %c0_i32_0 : i32, i32
  }
  func.func @transform_6(%arg0: i32, %arg1: memref<5xi32, #tpu.memory_space<smem>>) -> (i32, i32) {
    %c0_i32 = arith.constant 0 : i32
    %c0_i32_0 = arith.constant 0 : i32
    %c0_i32_1 = arith.constant 0 : i32
    return %c0_i32, %c0_i32_0 : i32, i32
  }
  func.func @transform_7(%arg0: i32, %arg1: memref<5xi32, #tpu.memory_space<smem>>) -> (i32, i32) {
    %c0_i32 = arith.constant 0 : i32
    %c0_i32_0 = arith.constant 0 : i32
    %c0_i32_1 = arith.constant 0 : i32
    return %c0_i32, %c0_i32_0 : i32, i32
  }
}

</mosaic_0001>

<bundles_post_ra>
// kernel: tpu_custom_call.1
= control target key start
LH: loop header
LB: loop body
LE: loop exit
PB: predicated region body
PF: predicated region fallthrough
CT: control target
= control target key end

     0   :  { %s1101_s30 = smov [#allocation3]   ;;  %s1324_s0 = inlined_call_operand.vmem [shape: s32[5], index: 0, kind: input, shape index: {}]   ;;  %s1325_s1 = inlined_call_operand.vmem [shape: f32[2,2560], index: 1, kind: input, shape index: {}]   ;;  %s1326_s2 = inlined_call_operand.vmem [shape: f32[2,2560], index: 2, kind: input, shape index: {}]   ;;  %s1327_s3 = inlined_call_operand.vmem [shape: f32[2,3,2560], index: 3, kind: input, shape index: {}]   ;;  %s1328_s4 = inlined_call_operand.vmem [shape: f32[2,3,2560], index: 4, kind: input, shape index: {}]   ;;  %s1329_s5 = inlined_call_operand.hbm [shape: f32[1,4], index: 5, kind: output, shape index: {0}]   ;;  %s1330_s6 = inlined_call_operand.hbm [shape: f32[1,4], index: 6, kind: output, shape index: {1}]   ;;  %s1331_s7 = inlined_call_operand.hbm [shape: f32[1,4], index: 7, kind: output, shape index: {2}]   ;;  %s1332_s8 = inlined_call_operand.hbm [shape: f32[2,4], index: 8, kind: output, shape index: {3}]  }
   0x1   :  { %s15_s29 = sshll.u32 %s1324_s0, 4  ;;  %s16_s29 = int_to_ptr.vmem [resolvable:$true] %s15_s29 }
   0x2   :  { %18 = dma.vmem_to_smem %s16_s29, 16, %s1101_s30, [#allocation2] }
   0x3   :  { %1075 = dma.done.wait [#allocation2], 16 }
   0x4   :  { %1076 = vsyncadd [#allocation2], 4294967280 }
   0x5   :  { %21 = sfence }
   0x6   :  { %22 = vsyncpa [#allocation7], 0 }
   0x7   :  { %23 = vsyncpa [#allocation9], 0 }
   0x8   :  { %24 = vsyncpa [#allocation12], 0  ;;  %s1156_s9 = smov 0   ;;  %s1158_s10 = smov 0  }
   0x9   :  { %s1160_s11 = smov 0  }
   0xa LB: > { %s1172_s0 = sadd.s32 4294967295, %s1099_s11   ;;  %s1175_s12 = sadd.s32 1, %s1099_s11   ;;  %s1099_s11 = sphi %s1160_s11, %s1336_s11   ;;  %s1095_s10 = sphi %s1158_s10, %s1335_s10   ;;  %s1091_s9 = sphi %s1156_s9, %s1334_s9  }
   0xb   : > { %s86_s13 = ssub.s32 %s1099_s11, %s1175_s12  ;;  %s89_s14 = sadd.s32 1, %s1095_s10 }
   0xc   : > { %p87_p0 = scmp.eq.s32.totalorder %s86_s13, 0  ;;  %p96_p1 = scmp.ne.s32.totalorder %s1095_s10, %s1091_s9 }
   0xd   : > { %p97_p2 = scmp.eq.s32.totalorder %s1099_s11, 0  ;;  %p845_p4 = scmp.ge.s32.totalorder %s1099_s11, 5 }
   0xe   : > { %s1184_s15 = scalar_select %p87_p0, %s1095_s10, %s89_s14  }
   0xf   : > { %p1186_p3 = por %p97_p2, %p96_p1  ;;  %232 = sbr.rel (%p845_p4) target bundleno = 36 (0x24), region = 16 }
  0x14   : > { %253 = sbr.rel (!%p1186_p3) target bundleno = 28 (0x1c), region = 28  ;;  %s255_s17 = sand.u32 (%p1186_p3), 1, %s1095_s10  }
  0x15   : > { %s872_s18 = sshll.u32 (%p1186_p3), %s1099_s11, 4  ;;  %s846_s19 = sshll.u32 (%p1186_p3), %s255_s17, 5 }
  0x16   : > { %s260_s22 = scalar_lea.vmem (%p1186_p3), %s1327_s3, %s872_s18  ;;  %s257_s23 = scalar_lea.vmem (%p1186_p3), [#allocation4], %s846_s19 }
  0x17   : > { %v273_v0 = vld [vmem:[%s260_s22] sm:$0xff] (%p1186_p3)  ;;  %v275_v1 = vld [vmem:[%s260_s22 + $0x8] sm:$0xff] (%p1186_p3)  ;;  %v277_v2 = vld [vmem:[%s260_s22 + $0x50] sm:$0xff] (%p1186_p3) }
  0x18   : > { %274 = vst [vmem:[%s257_s23] sm:$0xff] (%p1186_p3), %v273_v0  ;;  %v279_v3 = vld [vmem:[%s260_s22 + $0x58] sm:$0xff] (%p1186_p3) }
  0x19   : > { %276 = vst [vmem:[%s257_s23 + $0x8] sm:$0xff] %v275_v1 }
  0x1a   : > { %278 = vst [vmem:[%s257_s23 + $0x10] sm:$0xff] %v277_v2 }
  0x1b   : > { %280 = vst [vmem:[%s257_s23 + $0x18] sm:$0xff] %v279_v3 }
  0x1c PF: > { %286 = sbr.rel (!%p1186_p3) target bundleno = 36 (0x24), region = 51  ;;  %s288_s24 = sand.u32 (%p1186_p3), 1, %s1095_s10  }
  0x1d   : > { %s873_s25 = sshll.u32 (%p1186_p3), %s1099_s11, 4  ;;  %s849_s26 = sshll.u32 (%p1186_p3), %s288_s24, 5 }
  0x1e   : > { %s293_s29 = scalar_lea.vmem (%p1186_p3), %s1328_s4, %s873_s25  ;;  %s290_s30 = scalar_lea.vmem (%p1186_p3), [#allocation5], %s849_s26 }
  0x1f   : > { %v306_v4 = vld [vmem:[%s293_s29] sm:$0xff] (%p1186_p3)  ;;  %v308_v5 = vld [vmem:[%s293_s29 + $0x8] sm:$0xff] (%p1186_p3)  ;;  %v310_v6 = vld [vmem:[%s293_s29 + $0x50] sm:$0xff] (%p1186_p3) }
  0x20   : > { %307 = vst [vmem:[%s290_s30] sm:$0xff] (%p1186_p3), %v306_v4  ;;  %v312_v7 = vld [vmem:[%s293_s29 + $0x58] sm:$0xff] (%p1186_p3) }
  0x21   : > { %309 = vst [vmem:[%s290_s30 + $0x8] sm:$0xff] %v308_v5 }
  0x22   : > { %311 = vst [vmem:[%s290_s30 + $0x10] sm:$0xff] %v310_v6 }
  0x23   : > { %313 = vst [vmem:[%s290_s30 + $0x18] sm:$0xff] %v312_v7 }
  0x24 PF: > { %p852_p5 = scmp.ge.s32.totalorder %s1099_s11, 1  ;;  %p318_p6 = scmp.lt.s32.totalorder %s1099_s11, 6 }
  0x26   : > { %p319_p7 = pnand %p852_p5, %p318_p6 }
  0x27   : > { %s325_s13 = sand.u32 (!%p319_p7), 1, %s1091_s9   ;;  %s855_s14 = sshll.u32 (!%p319_p7), %s1172_s0, 2 }
  0x28   : > { %322 = sbr.rel (%p319_p7) target bundleno = 340 (0x154), region = 74  ;;  %s853_s16 = sshll.u32 (!%p319_p7), %s325_s13, 5 }
  0x29   : > { %p373_p8 = scmp.lt.s32.totalorder (!%p319_p7), %s855_s14, 19  ;;  %s1215_s24 = scalar_lea.vmem (!%p319_p7), [#allocation4], %s853_s16 }
  0x2a   : > { %s1217_s11 = scalar_lea.vmem (!%p319_p7), [#allocation5], %s853_s16  ;;  %p859_p9 = scmp.ne.s32.totalorder (!%p319_p7), %s1172_s0, 0 }
  0x2d   : > { %s1338_s14 = smov (!%p373_p8, %s855_s14), 19  ;;  %389 = sbr.rel (%p859_p9) target bundleno = 55 (0x37), region = 86 }
  0x2e   : > { %s856_s17 = sshll.u32 %s1338_s14, 1 }
  0x2f   : > { %s376_s20 = scalar_lea.vmem %s1325_s1, %s856_s17  ;;  %s382_s23 = scalar_lea.vmem %s1326_s2, %s856_s17 }
  0x32   : > { %vm390_vm0 = vcmask 24576   ;;  %v1102_v8 = vmov 0.0   ;;  %vm394_vm1 = vcmask 25600  }
  0x33   : > { %391 = vst.msk [vmem:[#allocation6] sm:$0x1] %vm390_vm0, %v1102_v8 }
  0x34   : > { %392 = vst.msk [vmem:[#allocation8] sm:$0x1] %vm390_vm0, %v1102_v8 }
  0x35   : > { %393 = vst.msk [vmem:[#allocation10] sm:$0x1] %vm390_vm0, %v1102_v8 }
  0x36   : > { %395 = vst.msk [vmem:[#allocation11] sm:$0x3] %vm394_vm1, %v1102_v8 }
  0x37 PF: > { %v403_v9 = vld [vmem:[%s376_s20] sm:$0xff]  ;;  %v477_v11 = vld [vmem:[%s1215_s24 + $0x10] sm:$0x77]  ;;  %vm518_vm2 = vcmask 1042432   ;;  %v475_v41 = vld [vmem:[%s1215_s24] sm:$0x77] }
  0x38   : > { %935 = vlog2.f32 %v403_v9  ;;  %v408_v10 = vsub.f32 1.0, %v403_v9  ;;  %v478_v12 = vld [vmem:[%s1215_s24 + $0x18] sm:$0x77]  ;;  %v481_v13 = vld [vmem:[%s1217_s11 + $0x10] sm:$0x77]  ;;  %vm428_vm3 = vcmask 1041408  }
  0x39   : > { %v482_v14 = vld [vmem:[%s1217_s11 + $0x18] sm:$0x77]  ;;  %v485_v15 = vsub.f32 %v477_v11, %v481_v13  ;;  %v476_v43 = vld [vmem:[%s1215_s24 + $0x8] sm:$0x77]  ;;  %v479_v44 = vld [vmem:[%s1217_s11] sm:$0x77] }
  0x3a   : > { %937 = vlog2.f32 %v408_v10  ;;  %v486_v16 = vsub.f32 %v478_v12, %v482_v14  ;;  %v1224_v20 = vld [vmem:[%s382_s23] sm:$0xff]  ;;  %v480_v45 = vld [vmem:[%s1217_s11 + $0x8] sm:$0x77]  ;;  %v483_v58 = vsub.f32 %v475_v41, %v479_v44  ;;  %vm591_vm4 = vcmask 1045508   ;;  %s396_s9 = sld [smem:[#allocation3 + %s1172_s0]]  ;;  %s1104_s26 = smov [#allocation6]  }
  0x3b   : > { %v489_v17 = vmul.f32 %v485_v15, %v485_v15  ;;  %v413_v25 = vsub.f32 1.0, %v1224_v20  ;;  %v484_v61 = vsub.f32 %v476_v43, %v480_v45  ;;  %vm593_vm5 = vcmask 1043456   ;;  %s682_s27 = sshll.u32 %s1104_s26, 4  ;;  %s684_s30 = sshll.u32 %s1329_s5, 4  ;;  %s683_s27 = int_to_ptr.vmem [resolvable:$true] %s682_s27  ;;  %s685_s30 = int_to_ptr.hbm [resolvable:$true] %s684_s30 }
  0x3c   : > { %v490_v18 = vmul.f32 %v486_v16, %v486_v16  ;;  %v487_v3 = vmul.f32 %v483_v58, %v483_v58  ;;  %vm603_vm6 = vcmask 1041409   ;;  %vm605_vm7 = vcmask 1043459   ;;  %p896_p10 = scmp.eq.s32.totalorder %s1172_s0, 4  ;;  %s1105_s13 = smov [#allocation11]  }
  0x3d   : > { %503 = vst [vmem:[#allocation1 + $0x20] ss:$2 sm:$0xff] %v489_v17  ;;  %v488_v5 = vmul.f32 %v484_v61, %v484_v61  ;;  %vm607_vm8 = vcmask 1045509   ;;  %vm609_vm9 = vcmask 1047559   ;;  %vm474_vm10 = vcmp.gt.f32.partialorder %v1224_v20, 0.5  ;;  %s718_s14 = sshll.u32 %s1105_s13, 4  ;;  %s719_s14 = int_to_ptr.vmem [resolvable:$true] %s718_s14 }
  0x3e   : > { %v936_v19 = vpop.eup %935  ;;  %505 = vst [vmem:[#allocation1 + $0x30] ss:$2 sm:$0xff] %v490_v18  ;;  %vm448_vm12 = vcmask 24576   ;;  %s720_s18 = sshll.u32 %s1332_s8, 4  ;;  %vm472_vm13 = vcmask 25600   ;;  %s1106_s20 = smov [#allocation8]   ;;  %s721_s18 = int_to_ptr.hbm [resolvable:$true] %s720_s18 }
  0x3f   : > { %v406_v21 = vmul.f32 0.6931472, %v936_v19  ;;  %s694_s21 = sshll.u32 %s1106_s20, 4  ;;  %s696_s24 = sshll.u32 %s1330_s6, 4  ;;  %s695_s21 = int_to_ptr.vmem [resolvable:$true] %s694_s21  ;;  %s697_s24 = int_to_ptr.hbm [resolvable:$true] %s696_s24 }
  0x40   : > { %v938_v22 = vpop.eup %937  ;;  %s708_s28 = sshll.u32 %s1331_s7, 4  ;;  %s709_s28 = int_to_ptr.hbm [resolvable:$true] %s708_s28 }
  0x41   : > { %v407_v23 = vmax.f32 %v406_v21, -100.0  ;;  %v410_v24 = vmul.f32 0.6931472, %v938_v22 }
  0x43   : > { %v411_v26 = vmax.f32 %v410_v24, -100.0  ;;  %v412_v27 = vmul.f32 %v407_v23, %v1224_v20 }
  0x44   : > { %v507_v30 = vld.sshfl [vmem:[#allocation1 + $0x28] sm:$0xff pattern:$0x75316420]  ;;  %v506_v34 = vld.sshfl [vmem:[#allocation1 + $0x20] sm:$0xff pattern:$0x75316420] }
  0x45   : > { %v414_v28 = vmul.f32 %v413_v25, %v411_v26  ;;  %v508_v32 = vld.sshfl [vmem:[#allocation1 + $0x30] sm:$0xff pattern:$0x75316420]  ;;  %v509_v33 = vld.sshfl [vmem:[#allocation1 + $0x38] sm:$0xff pattern:$0x75316420] }
  0x46   : > { %v554_v35 = vsel %vm518_vm2, %v507_v30, 0.0  ;;  %v561_v36 = vsel %vm518_vm2, %v508_v32, 0.0  ;;  %v568_v37 = vsel %vm518_vm2, %v509_v33, 0.0  ;;  %v547_v38 = vsel %vm518_vm2, %v506_v34, 0.0 }
  0x47   : > { %v415_v29 = vadd.f32 %v414_v28, %v412_v27  ;;  %v555_v39 = vrot.slane %v554_v35, 4  ;;  %v562_v40 = vrot.slane %v561_v36, 4  ;;  %v569_v42 = vrot.slane %v568_v37, 4 }
  0x48   : > { %v548_v46 = vrot.slane %v547_v38, 4 }
  0x49   : > { %v416_v31 = vsub.f32 0.0, %v415_v29  ;;  %v556_v51 = vadd.f32 %v555_v39, %v554_v35  ;;  %v563_v52 = vadd.f32 %v562_v40, %v561_v36  ;;  %v570_v56 = vadd.f32 %v569_v42, %v568_v37 }
  0x4a   : > { %v549_v59 = vadd.f32 %v548_v46, %v547_v38 }
  0x4b   : > { %419 = vst [vmem:[#allocation1] ss:$4 sm:$0xff] %v416_v31  ;;  %v557_v63 = vrot.slane %v556_v51, 2  ;;  %v564_v0 = vrot.slane %v563_v52, 2  ;;  %v571_v1 = vrot.slane %v570_v56, 2 }
  0x4c   : > { %v550_v4 = vrot.slane %v549_v59, 2 }
  0x4d   : > { %v558_v10 = vadd.f32 %v557_v63, %v556_v51  ;;  %v565_v11 = vadd.f32 %v564_v0, %v563_v52  ;;  %v572_v12 = vadd.f32 %v571_v1, %v570_v56 }
  0x4e   : > { %v551_v13 = vadd.f32 %v550_v4, %v549_v59 }
  0x4f   : > { %v559_v14 = vrot.slane %v558_v10, 1  ;;  %v566_v15 = vrot.slane %v565_v11, 1  ;;  %v573_v16 = vrot.slane %v572_v12, 1 }
  0x50   : > { %v552_v17 = vrot.slane %v551_v13, 1 }
  0x51   : > { %v560_v21 = vadd.f32 %v559_v14, %v558_v10  ;;  %v567_v22 = vadd.f32 %v566_v15, %v565_v11  ;;  %v574_v23 = vadd.f32 %v573_v16, %v572_v12 }
  0x52   : > { %v420_v47 = vld.sshfl [vmem:[#allocation1] sm:$0xff pattern:$0x73625140]  ;;  %v421_v48 = vld.sshfl [vmem:[#allocation1 + $0x8] sm:$0xff pattern:$0x73625140]  ;;  %v553_v26 = vadd.f32 %v552_v17, %v551_v13 }
  0x53   : > { %v422_v49 = vld.sshfl [vmem:[#allocation1 + $0x10] sm:$0xff pattern:$0x73625140]  ;;  %v423_v50 = vld.sshfl [vmem:[#allocation1 + $0x18] sm:$0xff pattern:$0x73625140] }
  0x54   : > { %v429_v53 = vsel %vm428_vm3, %v420_v47, 0.0  ;;  %v430_v54 = vsel %vm428_vm3, %v421_v48, 0.0  ;;  %v432_v55 = vsel %vm428_vm3, %v422_v49, 0.0  ;;  %452 = vst [vmem:[#allocation1] ss:$4 sm:$0xff] %v403_v9  ;;  %v434_v60 = vsel %vm428_vm3, %v423_v50, 0.0 }
  0x55   : > { %v431_v57 = vadd.f32 %v430_v54, %v429_v53  ;;  %v587_v35 = vrot.slane %v560_v21, 6  ;;  %v588_v36 = vrot.slane %v567_v22, 4  ;;  %v589_v37 = vrot.slane %v574_v23, 2 }
  0x56   : > { %v1103_v13 = vmov 0.0  }
  0x57   : > { %v433_v62 = vadd.f32 %v432_v55, %v431_v57  ;;  %v595_v46 = vsel %vm428_vm3, %v553_v26, %v587_v35  ;;  %v596_v47 = vsel %vm591_vm4, %v588_v36, %v589_v37  ;;  %v861_v14 = vsel %vm474_vm10, 1.0, %v1103_v13 }
  0x58   : > { %v597_v56 = vsel %vm593_vm5, %v595_v46, %v596_v47 }
  0x59   : > { %v435_v2 = vadd.f32 %v434_v60, %v433_v62  ;;  %v602_v0 = vrot.slane %v597_v56, 7 }
  0x5b   : > { %v1240_v6 = vld.sshfl [vmem:[#allocation1] sm:$0xff pattern:$0x73625140]  ;;  %v1242_v7 = vld.sshfl [vmem:[#allocation1 + $0x8] sm:$0xff pattern:$0x73625140]  ;;  %436 = vadd.xlane.f32.xlu0 %v435_v2 }
  0x5c   : > { %v1244_v8 = vld.sshfl [vmem:[#allocation1 + $0x10] sm:$0xff pattern:$0x73625140]  ;;  %v1246_v9 = vld.sshfl [vmem:[#allocation1 + $0x18] sm:$0xff pattern:$0x73625140] }
  0x5d   : > { %495 = vst [vmem:[#allocation1] ss:$2 sm:$0xff] %v487_v3  ;;  %v461_v26 = vsel %vm428_vm3, %v1240_v6, 0.0  ;;  %v464_v6 = vsel %vm428_vm3, %v1244_v8, 0.0 }
  0x5e   : > { %497 = vst [vmem:[#allocation1 + $0x10] ss:$2 sm:$0xff] %v488_v5 }
  0x64   : > { %v498_v18 = vld.sshfl [vmem:[#allocation1] sm:$0xff pattern:$0x75316420]  ;;  %v499_v19 = vld.sshfl [vmem:[#allocation1 + $0x8] sm:$0xff pattern:$0x75316420] }
  0x65   : > { %v500_v24 = vld.sshfl [vmem:[#allocation1 + $0x10] sm:$0xff pattern:$0x75316420]  ;;  %v501_v25 = vld.sshfl [vmem:[#allocation1 + $0x18] sm:$0xff pattern:$0x75316420] }
  0x66   : > { %v519_v27 = vsel %vm518_vm2, %v498_v18, 0.0  ;;  %v526_v28 = vsel %vm518_vm2, %v499_v19, 0.0  ;;  %v533_v29 = vsel %vm518_vm2, %v500_v24, 0.0  ;;  %v540_v30 = vsel %vm518_vm2, %v501_v25, 0.0 }
  0x67   : > { %v520_v31 = vrot.slane %v519_v27, 4  ;;  %v527_v32 = vrot.slane %v526_v28, 4  ;;  %v534_v33 = vrot.slane %v533_v29, 4  ;;  %v541_v34 = vrot.slane %v540_v30, 4 }
  0x69   : > { %v521_v38 = vadd.f32 %v520_v31, %v519_v27  ;;  %v528_v39 = vadd.f32 %v527_v32, %v526_v28  ;;  %v535_v40 = vadd.f32 %v534_v33, %v533_v29  ;;  %v542_v41 = vadd.f32 %v541_v34, %v540_v30 }
  0x6a   : > { %v462_v34 = vsel %vm428_vm3, %v1242_v7, 0.0 }
  0x6b   : > { %v522_v42 = vrot.slane %v521_v38, 2  ;;  %v529_v43 = vrot.slane %v528_v39, 2  ;;  %v536_v44 = vrot.slane %v535_v40, 2  ;;  %v543_v45 = vrot.slane %v542_v41, 2 }
  0x6d   : > { %v523_v48 = vadd.f32 %v522_v42, %v521_v38  ;;  %v530_v49 = vadd.f32 %v529_v43, %v528_v39  ;;  %v537_v50 = vadd.f32 %v536_v44, %v535_v40  ;;  %v544_v51 = vadd.f32 %v543_v45, %v542_v41 }
  0x6e   : > { %v463_v38 = vadd.f32 %v462_v34, %v461_v26  ;;  %v466_v41 = vsel %vm428_vm3, %v1246_v9, 0.0 }
  0x6f   : > { %v524_v52 = vrot.slane %v523_v48, 1  ;;  %v531_v53 = vrot.slane %v530_v49, 1  ;;  %v538_v54 = vrot.slane %v537_v50, 1  ;;  %v545_v55 = vrot.slane %v544_v51, 1 }
  0x70   : > { %v465_v40 = vadd.f32 %v464_v6, %v463_v38 }
  0x71   : > { %v525_v57 = vadd.f32 %v524_v52, %v523_v48  ;;  %v532_v58 = vadd.f32 %v531_v53, %v530_v49  ;;  %v539_v59 = vadd.f32 %v538_v54, %v537_v50  ;;  %v546_v60 = vadd.f32 %v545_v55, %v544_v51 }
  0x72   : > { %v467_v42 = vadd.f32 %v466_v41, %v465_v40 }
  0x73   : > { %v584_v61 = vrot.slane %v532_v58, 6  ;;  %v585_v62 = vrot.slane %v539_v59, 4  ;;  %v586_v63 = vrot.slane %v546_v60, 2 }
  0x75   : > { %v590_v1 = vsel %vm428_vm3, %v525_v57, %v584_v61  ;;  %v592_v2 = vsel %vm591_vm4, %v585_v62, %v586_v63  ;;  %v397_v57 = vlaneseq  ;;  %v399_v61 = vstv %s396_s9  ;;  %s1107_s9 = smov [#allocation10]  }
  0x76   : > { %v594_v3 = vsel %vm593_vm5, %v590_v1, %v592_v2  ;;  %v417_v1 = vld [vmem:[#allocation6] sm:$0x1] }
  0x77   : > { %v604_v4 = vsel %vm603_vm6, %v602_v0, %v594_v3  ;;  %v398_v60 = vand.u32 127, %v397_v57 }
  0x78   : > { %v606_v5 = vsel %vm605_vm7, %v602_v0, %v604_v4 }
  0x79   : > { %v608_v10 = vsel %vm607_vm8, %v602_v0, %v606_v5  ;;  %vm400_vm11 = vcmp.eq.s32.totalorder %v398_v60, %v399_v61 }
  0x7a   : > { %v610_v11 = vsel %vm609_vm9, %v602_v0, %v608_v10  ;;  %v860_v0 = vsel %vm400_vm11, 1.0, %v1103_v13  ;;  %v575_v13 = vld [vmem:[#allocation8] sm:$0x1] }
  0x7b   : > { %v612_v12 = vsel %vm474_vm10, %v610_v11, 0.0  ;;  %v450_v11 = vld [vmem:[#allocation11] sm:$0x3] }
  0x7c   : > { %614 = vst [vmem:[#allocation1] ss:$4 sm:$0xff] %v612_v12 }
  0x83   : > { %v615_v15 = vld.sshfl [vmem:[#allocation1] sm:$0xff pattern:$0x73625140]  ;;  %v616_v16 = vld.sshfl [vmem:[#allocation1 + $0x8] sm:$0xff pattern:$0x73625140] }
  0x84   : > { %v617_v17 = vld.sshfl [vmem:[#allocation1 + $0x10] sm:$0xff pattern:$0x73625140]  ;;  %v618_v18 = vld.sshfl [vmem:[#allocation1 + $0x18] sm:$0xff pattern:$0x73625140] }
  0x85   : > { %v623_v19 = vsel %vm428_vm3, %v615_v15, 0.0  ;;  %v624_v21 = vsel %vm428_vm3, %v616_v16, 0.0  ;;  %v626_v22 = vsel %vm428_vm3, %v617_v17, 0.0  ;;  %647 = vst [vmem:[#allocation1] ss:$4 sm:$0xff] %v861_v14  ;;  %v628_v23 = vsel %vm428_vm3, %v618_v18, 0.0 }
  0x86   : > { %v625_v20 = vadd.f32 %v624_v21, %v623_v19  ;;  %v643_v17 = vld [vmem:[#allocation10] sm:$0x1] }
  0x88   : > { %v627_v24 = vadd.f32 %v626_v22, %v625_v20 }
  0x8a   : > { %v629_v25 = vadd.f32 %v628_v23, %v627_v24 }
  0x8c   : > { %630 = vadd.xlane.f32.xlu0 %v629_v25  ;;  %v648_v27 = vld.sshfl [vmem:[#allocation1] sm:$0xff pattern:$0x73625140]  ;;  %v649_v28 = vld.sshfl [vmem:[#allocation1 + $0x8] sm:$0xff pattern:$0x73625140] }
  0x8d   : > { %v650_v29 = vld.sshfl [vmem:[#allocation1 + $0x10] sm:$0xff pattern:$0x73625140]  ;;  %v651_v30 = vld.sshfl [vmem:[#allocation1 + $0x18] sm:$0xff pattern:$0x73625140] }
  0x8e   : > { %v656_v31 = vsel %vm428_vm3, %v648_v27, 0.0  ;;  %v657_v32 = vsel %vm428_vm3, %v649_v28, 0.0  ;;  %v659_v33 = vsel %vm428_vm3, %v650_v29, 0.0  ;;  %v661_v36 = vsel %vm428_vm3, %v651_v30, 0.0 }
  0x8f   : > { %v658_v35 = vadd.f32 %v657_v32, %v656_v31 }
  0x91   : > { %v660_v37 = vadd.f32 %v659_v33, %v658_v35 }
  0x93   : > { %v662_v39 = vadd.f32 %v661_v36, %v660_v37 }
  0x95   : > { %663 = vadd.xlane.f32.xlu1 %v662_v39 }
  0x9d   : > { %468 = vadd.xlane.f32.xlu1 %v467_v42 }
  0xce   : > { %v437_v43 = vpop.xlane.xlu0 %436 }
  0xcf   : > { %v438_v44 = vrot.slane %v437_v43, 4 }
  0xd1   : > { %v439_v7 = vadd.f32 %v438_v44, %v437_v43 }
  0xd3   : > { %v440_v45 = vrot.slane %v439_v7, 2 }
  0xd5   : > { %v441_v46 = vadd.f32 %v440_v45, %v439_v7 }
  0xd7   : > { %v442_v47 = vrot.slane %v441_v46, 1 }
  0xd9   : > { %v443_v48 = vadd.f32 %v442_v47, %v441_v46 }
  0xdb   : > { %874 = vpush %v443_v48 }
  0xff   : > { %v631_v49 = vpop.xlane.xlu0 %630 }
 0x100   : > { %v632_v50 = vrot.slane %v631_v49, 4 }
 0x102   : > { %v633_v8 = vadd.f32 %v632_v50, %v631_v49 }
 0x104   : > { %v634_v51 = vrot.slane %v633_v8, 2 }
 0x106   : > { %v635_v52 = vadd.f32 %v634_v51, %v633_v8 }
 0x108   : > { %v664_v53 = vpop.xlane.xlu1 %663  ;;  %v636_v54 = vrot.slane %v635_v52, 1 }
 0x109   : > { %v665_v9 = vrot.slane %v664_v53, 4 }
 0x10a   : > { %v637_v55 = vadd.f32 %v636_v54, %v635_v52 }
 0x10b   : > { %v666_v56 = vadd.f32 %v665_v9, %v664_v53 }
 0x10c   : > { %876 = vpush %v637_v55  ;;  %s875_s25 = spop %874 }
 0x10d   : > { %v667_v58 = vrot.slane %v666_v56, 2  ;;  %v445_v2 = vstv %s875_s25  ;;  %s706_s25 = sshll.u32 %s1107_s9, 4  ;;  %s707_s25 = int_to_ptr.vmem [resolvable:$true] %s706_s25 }
 0x10e   : > { %v446_v3 = vmul.f32 %v860_v0, %v445_v2 }
 0x10f   : > { %v668_v59 = vadd.f32 %v667_v58, %v666_v56 }
 0x110   : > { %v447_v4 = vadd.f32 %v446_v3, %v417_v1  ;;  %v469_v5 = vpop.xlane.xlu1 %468 }
 0x111   : > { %v669_v62 = vrot.slane %v668_v59, 1  ;;  %v470_v10 = vmul.f32 %v860_v0, %v469_v5 }
 0x112   : > { %449 = vst.msk [vmem:[#allocation6] sm:$0x1] %vm448_vm12, %v447_v4 }
 0x113   : > { %v670_v63 = vadd.f32 %v669_v62, %v668_v59  ;;  %881 = dma.vmem_to_hbm [thread:$0]  (%p896_p10), %s683_s27, 16, %s685_s30, [#allocation7]   ;;  %v471_v12 = vadd.f32 %v470_v10, %v450_v11 }
 0x115   : > { %878 = vpush %v670_v63 }
 0x116   : > { %473 = vst.msk [vmem:[#allocation11] sm:$0x3] %vm472_vm13, %v471_v12 }
 0x117   : > { %887 = dma.vmem_to_hbm [thread:$0]  (%p896_p10), %s719_s14, 32, %s721_s18, [#allocation12]  }
 0x13d   : > { %s877_s19 = spop %876 }
 0x13e   : > { %v639_v14 = vstv %s877_s19 }
 0x13f   : > { %v640_v15 = vmul.f32 %v860_v0, %v639_v14 }
 0x141   : > { %v641_v16 = vadd.f32 %v640_v15, %v575_v13 }
 0x143   : > { %642 = vst.msk [vmem:[#allocation8] sm:$0x1] %vm448_vm12, %v641_v16 }
 0x144   : > { %883 = dma.vmem_to_hbm [thread:$0]  (%p896_p10), %s695_s21, 16, %s697_s24, [#allocation9]  }
 0x146   : > { %s879_s11 = spop %878 }
 0x147   : > { %v672_v18 = vstv %s879_s11 }
 0x148   : > { %v673_v19 = vmul.f32 %v860_v0, %v672_v18 }
 0x14a   : > { %v674_v21 = vadd.f32 %v673_v19, %v643_v17 }
 0x14c   : > { %675 = vst.msk [vmem:[#allocation10] sm:$0x1] %vm448_vm12, %v674_v21 }
 0x14d   : > { %885 = dma.vmem_to_hbm [thread:$0]  (%p896_p10), %s707_s25, 16, %s709_s28, [#allocation9]  }
 0x14e   : > { %1078 = dma.done.wait (%p896_p10), [#allocation7], 16  }
 0x14f   : > { %1080 = vsyncadd (%p896_p10), [#allocation7], 4294967280 }
 0x150   : > { %1082 = dma.done.wait (%p896_p10), [#allocation9], 32  }
 0x151   : > { %1084 = vsyncadd (%p896_p10), [#allocation9], 4294967264 }
 0x152   : > { %1086 = dma.done.wait (%p896_p10), [#allocation12], 32  }
 0x153   : > { %1088 = vsyncadd (%p896_p10), [#allocation12], 4294967264 }
 0x154 PF: > { %p27_p11 = scmp.ge.s32.totalorder %s1175_s12, 7   ;;  %s1334_s9 = smov %s1095_s10 }
 0x155   : > { %s1335_s10 = smov %s1184_s15  ;;  %s1336_s11 = smov %s1175_s12 }
 0x156   :  { %29 = sbr.rel (!%p27_p11) target bundleno = 10 (0xa), region = 159 }
 0x15b   :  { %749 = vsyncpa [#allocation7], 1 }
 0x15c   :  { %751 = vsyncpa [#allocation7 + $0x1], 1 }
 0x15d   :  { %752 = vsyncpa [#allocation9], 1 }
 0x15e   :  { %753 = vsyncpa [#allocation12], 1 }

</bundles_post_ra>
